<compile_context>
chip_gen: v5e
topology: v5e:2x2
jax: 0.10.0
libtpu: 0.0.40
codegen_flags: <defaults>
</compile_context>

<pallas_src>
import jax
import jax.numpy as jnp
from jax import lax
from jax.experimental import pallas as pl
from jax.experimental.pallas import tpu as pltpu

_EPS = 1e-5


# ----------------------------------------------------------------------------
# Kernel 1: fused conv (both branches in a single MXU dot, channels on
# sublanes, spatial on lanes) + single-pass BN statistics accumulated across
# the M-tiled grid (resident accumulator outputs).
# ----------------------------------------------------------------------------
def _conv_stats_kernel(pT_ref, wT_ref, conv_ref, sum_ref, ssq_ref):
    @pl.when(pl.program_id(0) == 0)
    def _():
        sum_ref[...] = jnp.zeros_like(sum_ref)
        ssq_ref[...] = jnp.zeros_like(ssq_ref)

    # (2*Cout, Ktot) @ (Ktot, TM) -> (2*Cout, TM)  (lane-dense result tile)
    c = jnp.dot(wT_ref[...], pT_ref[...], preferred_element_type=jnp.float32)
    conv_ref[...] = c
    sum_ref[...] += jnp.sum(c, axis=1, keepdims=True)
    ssq_ref[...] += jnp.sum(c * c, axis=1, keepdims=True)


# ----------------------------------------------------------------------------
# Kernel 2: folded BN (per-channel scale/shift FMA) + residual add + ReLU.
# Pure lane-dense elementwise epilogue; M axis is "parallel".
# ----------------------------------------------------------------------------
def _bn_add_relu_kernel(conv_ref, ss_ref, out_ref):
    cout = out_ref.shape[0]
    ss = ss_ref[...]                              # (2*Cout, 2): [:,0]=scale, [:,1]=shift
    z = conv_ref[...] * ss[:, 0:1] + ss[:, 1:2]   # per-channel FMA, lane-dense
    out_ref[...] = jnp.maximum(z[:cout, :] + z[cout:, :], 0.0)


# ----------------------------------------------------------------------------
# Wrapper
# ----------------------------------------------------------------------------
def repeated_block_forward(x_nchw, params, *, kernel_size, stride, padding,
                           block_m=256):
    """x_nchw: (N, Cin, H, W) float32 -> (N, Cout, OH, OW) float32."""
    KH = KW = kernel_size
    S, P = stride, padding
    N, Cin, H, W = x_nchw.shape
    w1 = params["w1"]                              # (KH, KW, Cin, Cout)  HWIO
    w2 = params["w2"]                              # (Cin, Cout)          1x1 conv
    Cout = w1.shape[-1]
    C2 = 2 * Cout

    OH = (H + 2 * P - KH) // S + 1
    OW = (W + 2 * P - KW) // S + 1
    M = N * OH * OW

    f32 = jnp.float32
    x = x_nchw.astype(f32)

    # --- transposed patch matrix pT: (KH*KW*Cin, M), spatial on the lane axis.
    # (Plain-JAX data movement; in-kernel per-tap shifted dots would avoid the
    #  K^2x HBM inflation for large inputs — not needed at these sizes.)
    xp = jnp.pad(x, ((0, 0), (0, 0), (P, P), (P, P)))
    taps = []
    for kh in range(KH):
        for kw in range(KW):
            sl = lax.slice(xp, (0, 0, kh, kw),
                           (N, Cin, kh + (OH - 1) * S + 1, kw + (OW - 1) * S + 1),
                           (1, 1, S, S))           # (N, Cin, OH, OW)
            taps.append(jnp.transpose(sl, (1, 0, 2, 3)).reshape(Cin, M))
    pT = jnp.concatenate(taps, axis=0).astype(f32)
    Ktot = KH * KW * Cin

    # --- fused weight (2*Cout, Ktot): main conv rows + 1x1 shortcut embedded.
    w1_flat = w1.reshape(Ktot, Cout).astype(f32)
    if P < KH and P < KW:
        # The shortcut's 1x1 stride-S input equals the im2col tap (P, P).
        t0 = (P * KW + P) * Cin
        w2_emb = jnp.zeros((Ktot, Cout), f32).at[t0:t0 + Cin, :].set(w2.astype(f32))
        wT = jnp.concatenate([w1_flat, w2_emb], axis=1).T          # (2*Cout, Ktot)
    else:
        # Shortcut tap lies outside the KxK window: append its Cin rows.
        sc = lax.slice(x, (0, 0, 0, 0),
                       (N, Cin, (OH - 1) * S + 1, (OW - 1) * S + 1),
                       (1, 1, S, S))
        pT = jnp.concatenate(
            [pT, jnp.transpose(sc, (1, 0, 2, 3)).reshape(Cin, M).astype(f32)], axis=0)
        top = jnp.concatenate([w1_flat, jnp.zeros((Cin, Cout), f32)], axis=0)
        bot = jnp.concatenate([jnp.zeros((Ktot, Cout), f32), w2.astype(f32)], axis=0)
        wT = jnp.concatenate([top, bot], axis=1).T
        Ktot += Cin

    # NOTE: conv biases b1/b2 are intentionally unused — train-mode BatchNorm
    # subtracts the per-channel batch mean, which cancels any per-channel
    # constant added by the convolution bias.

    # --- pad M so every grid block is fully in-bounds.  Zero-padded patch
    # columns give conv == 0 (no bias), so sum / sum-of-squares are unaffected
    # as long as the statistics are divided by the true M.
    tm = int(block_m)
    assert tm % 128 == 0, "block_m must be a multiple of 128 (lane tile)"
    n_tiles = -(-M // tm)
    Mpad = n_tiles * tm
    if Mpad > M:
        pT = jnp.pad(pT, ((0, 0), (0, Mpad - M)))

    # --- phase 1: fused conv + single-pass statistics ---
    conv, csum, cssq = pl.pallas_call(
        _conv_stats_kernel,
        out_shape=(jax.ShapeDtypeStruct((C2, Mpad), f32),
                   jax.ShapeDtypeStruct((C2, 1), f32),
                   jax.ShapeDtypeStruct((C2, 1), f32)),
        grid=(n_tiles,),
        in_specs=[pl.BlockSpec((Ktot, tm), lambda i: (0, i)),
                  pl.BlockSpec((C2, Ktot), lambda i: (0, 0))],
        out_specs=(pl.BlockSpec((C2, tm), lambda i: (0, i)),
                   pl.BlockSpec((C2, 1), lambda i: (0, 0)),
                   pl.BlockSpec((C2, 1), lambda i: (0, 0))),
        compiler_params=pltpu.CompilerParams(
            dimension_semantics=("arbitrary",),           # resident stat accumulators
            vmem_limit_bytes=32 * 1024 * 1024),
    )(pT, wT)

    # --- fold bias + BN into a packed per-channel scale/shift (tiny, plain JAX)
    inv_m = jnp.float32(1.0 / M)
    mu = csum * inv_m
    var = cssq * inv_m - mu * mu                          # biased variance
    gamma = jnp.concatenate([params["g1"], params["g2"]]).reshape(C2, 1).astype(f32)
    beta = jnp.concatenate([params["be1"], params["be2"]]).reshape(C2, 1).astype(f32)
    scale = gamma * lax.rsqrt(var + _EPS)
    shift = beta - mu * scale
    ss = jnp.concatenate([scale, shift], axis=1)          # (2*Cout, 2) packed params

    # --- phase 2: scale/shift FMA + residual add + ReLU (lane-dense output) ---
    out_t = pl.pallas_call(
        _bn_add_relu_kernel,
        out_shape=jax.ShapeDtypeStruct((Cout, Mpad), f32),
        grid=(n_tiles,),
        in_specs=[pl.BlockSpec((C2, tm), lambda i: (0, i)),
                  pl.BlockSpec((C2, 2), lambda i: (0, 0))],
        out_specs=pl.BlockSpec((Cout, tm), lambda i: (0, i)),
        compiler_params=pltpu.CompilerParams(
            dimension_semantics=("parallel",),            # megacore-shardable
            vmem_limit_bytes=32 * 1024 * 1024),
    )(conv, ss)

    out = out_t[:, :M].reshape(Cout, N, OH, OW)
    return jnp.transpose(out, (1, 0, 2, 3))               # -> NCHW


# ----------------------------------------------------------------------------
# Pure-JAX reference (PyTorch train-mode semantics) for the correctness check.
# ----------------------------------------------------------------------------
def _reference(x_nchw, params, *, kernel_size, stride, padding):
    eps = _EPS
    x = jnp.transpose(x_nchw, (0, 2, 3, 1))               # NHWC
    dn = ("NHWC", "HWIO", "NHWC")

    def bn_train(z, g, b):
        mu = jnp.mean(z, axis=(0, 1, 2), keepdims=True)
        var = jnp.mean((z - mu) ** 2, axis=(0, 1, 2), keepdims=True)
        return g * (z - mu) * lax.rsqrt(var + eps) + b

    c1 = lax.conv_general_dilated(x, params["w1"], (stride, stride),
                                  [(padding, padding)] * 2,
                                  dimension_numbers=dn) + params["b1"]
    y = bn_train(c1, params["g1"], params["be1"])
    c2 = lax.conv_general_dilated(x, params["w2"].reshape(1, 1, *params["w2"].shape),
                                  (stride, stride), [(0, 0)] * 2,
                                  dimension_numbers=dn) + params["b2"]
    xs = bn_train(c2, params["g2"], params["be2"])
    out = jnp.maximum(xs + y, 0.0)
    return jnp.transpose(out, (0, 3, 1, 2))


if __name__ == "__main__":
    # Small shapes consistent with the module.
    N, Cin, H, W = 2, 4, 16, 16
    Cout, K, S, P = 8, 3, 1, 1

    key = jax.random.PRNGKey(0)
    k_x, k_w1, k_b1, k_w2, k_b2 = jax.random.split(key, 5)

    x = jax.random.normal(k_x, (N, Cin, H, W), jnp.float32)
    params = dict(
        w1=jax.random.normal(k_w1, (K, K, Cin, Cout), jnp.float32) * 0.1,  # HWIO
        b1=jax.random.normal(k_b1, (Cout,), jnp.float32) * 0.1,
        g1=jnp.ones((Cout,), jnp.float32),     # BatchNorm2d default gamma
        be1=jnp.zeros((Cout,), jnp.float32),   # BatchNorm2d default beta
        w2=jax.random.normal(k_w2, (Cin, Cout), jnp.float32) * 0.1,        # 1x1 conv
        b2=jax.random.normal(k_b2, (Cout,), jnp.float32) * 0.1,
        g2=jnp.ones((Cout,), jnp.float32),
        be2=jnp.zeros((Cout,), jnp.float32),
    )

    out = repeated_block_forward(x, params, kernel_size=K, stride=S, padding=P)
    out = jax.block_until_ready(out)

    ref = jax.block_until_ready(
        _reference(x, params, kernel_size=K, stride=S, padding=P))
    assert out.shape == (N, Cout, H, W), out.shape
    max_err = float(jnp.max(jnp.abs(out - ref)))
    assert jnp.allclose(out, ref, rtol=1e-4, atol=1e-3), max_err

    print("KERNEL_OK")
</pallas_src>

<mosaic_0001>
module attributes {stable_mosaic.version = 11 : i64} {
  func.func @_conv_stats_kernel(%arg0: i32, %arg1: memref<36x256xf32, #tpu.memory_space<vmem>>, %arg2: memref<16x36xf32, #tpu.memory_space<vmem>>, %arg3: memref<16x256xf32, #tpu.memory_space<vmem>>, %arg4: memref<16x1xf32, #tpu.memory_space<vmem>>, %arg5: memref<16x1xf32, #tpu.memory_space<vmem>>) attributes {dimension_semantics = [#tpu.dimension_semantics<arbitrary>], iteration_bounds = array<i64: 2>, scalar_prefetch = 0 : i64, scratch_operands = 0 : i64, tpu.core_type = #tpu.core_type<tc>, window_params = [{transform_indices = @transform_0, window_bounds = array<i64: 36, 256>}, {pipeline_mode = #tpu.pipeline_mode<synchronous>, transform_indices = @transform_1, window_bounds = array<i64: 16, 36>}, {transform_indices = @transform_2, window_bounds = array<i64: 16, 256>}, {pipeline_mode = #tpu.pipeline_mode<synchronous>, transform_indices = @transform_3, window_bounds = array<i64: 16, 1>}, {pipeline_mode = #tpu.pipeline_mode<synchronous>, transform_indices = @transform_4, window_bounds = array<i64: 16, 1>}]} {
    %c0_i32 = arith.constant 0 : i32
    %0 = arith.cmpi eq, %arg0, %c0_i32 : i32
    %1 = arith.extui %0 : i1 to i32
    %c0_i32_0 = arith.constant 0 : i32
    %2 = arith.cmpi ne, %1, %c0_i32_0 : i32
    scf.if %2 {
      %cst_16 = arith.constant 0.000000e+00 : f32
      %18 = vector.broadcast %cst_16 : f32 to vector<16x1xf32>
      %c0_17 = arith.constant 0 : index
      %c0_18 = arith.constant 0 : index
      %19 = vector.load %arg4[%c0_17, %c0_18] : memref<16x1xf32, #tpu.memory_space<vmem>>, vector<16x1xf32>
      tpu.vector_store %arg4[%c0_17, %c0_18], %18 {strides = array<i32>} : memref<16x1xf32, #tpu.memory_space<vmem>>, vector<16x1xf32>,
      %cst_19 = arith.constant 0.000000e+00 : f32
      %20 = vector.broadcast %cst_19 : f32 to vector<16x1xf32>
      %c0_20 = arith.constant 0 : index
      %c0_21 = arith.constant 0 : index
      %21 = vector.load %arg5[%c0_20, %c0_21] : memref<16x1xf32, #tpu.memory_space<vmem>>, vector<16x1xf32>
      tpu.vector_store %arg5[%c0_20, %c0_21], %20 {strides = array<i32>} : memref<16x1xf32, #tpu.memory_space<vmem>>, vector<16x1xf32>,
    } else {
    }
    %c0 = arith.constant 0 : index
    %c0_1 = arith.constant 0 : index
    %3 = vector.load %arg2[%c0, %c0_1] : memref<16x36xf32, #tpu.memory_space<vmem>>, vector<16x36xf32>
    %c0_2 = arith.constant 0 : index
    %c0_3 = arith.constant 0 : index
    %4 = vector.load %arg1[%c0_2, %c0_3] : memref<36x256xf32, #tpu.memory_space<vmem>>, vector<36x256xf32>
    %cst = arith.constant dense<0.000000e+00> : vector<16x256xf32>
    %5 = tpu.matmul %3, %4, %cst {dimension_numbers = #tpu.dot_dimension_numbers<[1], [0], [0], [1], [0, 0, 1, 1], [], []>} : vector<16x36xf32>, vector<36x256xf32>, vector<16x256xf32> -> vector<16x256xf32>
    %c0_4 = arith.constant 0 : index
    %c0_5 = arith.constant 0 : index
    %6 = vector.load %arg3[%c0_4, %c0_5] : memref<16x256xf32, #tpu.memory_space<vmem>>, vector<16x256xf32>
    tpu.vector_store %arg3[%c0_4, %c0_5], %5 {strides = array<i32>} : memref<16x256xf32, #tpu.memory_space<vmem>>, vector<16x256xf32>,
    %c0_6 = arith.constant 0 : index
    %c0_7 = arith.constant 0 : index
    %7 = vector.load %arg4[%c0_6, %c0_7] : memref<16x1xf32, #tpu.memory_space<vmem>>, vector<16x1xf32>
    %cst_8 = arith.constant dense<0.000000e+00> : vector<16xf32>
    %8 = vector.multi_reduction <add>, %5, %cst_8 [1] : vector<16x256xf32> to vector<16xf32>
    %9 = vector.shape_cast %8 : vector<16xf32> to vector<16x1xf32>
    %10 = arith.addf %7, %9 : vector<16x1xf32>
    %c0_9 = arith.constant 0 : index
    %c0_10 = arith.constant 0 : index
    %11 = vector.load %arg4[%c0_9, %c0_10] : memref<16x1xf32, #tpu.memory_space<vmem>>, vector<16x1xf32>
    tpu.vector_store %arg4[%c0_9, %c0_10], %10 {strides = array<i32>} : memref<16x1xf32, #tpu.memory_space<vmem>>, vector<16x1xf32>,
    %c0_11 = arith.constant 0 : index
    %c0_12 = arith.constant 0 : index
    %12 = vector.load %arg5[%c0_11, %c0_12] : memref<16x1xf32, #tpu.memory_space<vmem>>, vector<16x1xf32>
    %13 = arith.mulf %5, %5 : vector<16x256xf32>
    %cst_13 = arith.constant dense<0.000000e+00> : vector<16xf32>
    %14 = vector.multi_reduction <add>, %13, %cst_13 [1] : vector<16x256xf32> to vector<16xf32>
    %15 = vector.shape_cast %14 : vector<16xf32> to vector<16x1xf32>
    %16 = arith.addf %12, %15 : vector<16x1xf32>
    %c0_14 = arith.constant 0 : index
    %c0_15 = arith.constant 0 : index
    %17 = vector.load %arg5[%c0_14, %c0_15] : memref<16x1xf32, #tpu.memory_space<vmem>>, vector<16x1xf32>
    tpu.vector_store %arg5[%c0_14, %c0_15], %16 {strides = array<i32>} : memref<16x1xf32, #tpu.memory_space<vmem>>, vector<16x1xf32>,
    return
  }
  func.func @transform_0(%arg0: i32) -> (i32, i32) {
    %c0_i32 = arith.constant 0 : i32
    %c0_i32_0 = arith.constant 0 : i32
    return %c0_i32, %arg0 : i32, i32
  }
  func.func @transform_1(%arg0: i32) -> (i32, i32) {
    %c0_i32 = arith.constant 0 : i32
    %c0_i32_0 = arith.constant 0 : i32
    %c0_i32_1 = arith.constant 0 : i32
    return %c0_i32, %c0_i32_0 : i32, i32
  }
  func.func @transform_2(%arg0: i32) -> (i32, i32) {
    %c0_i32 = arith.constant 0 : i32
    %c0_i32_0 = arith.constant 0 : i32
    return %c0_i32, %arg0 : i32, i32
  }
  func.func @transform_3(%arg0: i32) -> (i32, i32) {
    %c0_i32 = arith.constant 0 : i32
    %c0_i32_0 = arith.constant 0 : i32
    %c0_i32_1 = arith.constant 0 : i32
    return %c0_i32, %c0_i32_0 : i32, i32
  }
  func.func @transform_4(%arg0: i32) -> (i32, i32) {
    %c0_i32 = arith.constant 0 : i32
    %c0_i32_0 = arith.constant 0 : i32
    %c0_i32_1 = arith.constant 0 : i32
    return %c0_i32, %c0_i32_0 : i32, i32
  }
}

</mosaic_0001>

<bundles_post_ra>
// kernel: tpu_custom_call.1
= control target key start
LH: loop header
LB: loop body
LE: loop exit
PB: predicated region body
PF: predicated region fallthrough
CT: control target
= control target key end

     0   :  { %10 = vsyncpa [#allocation3], 0  ;;  %s929_s0 = inlined_call_operand.hbm [shape: f32[36,512], index: 0, kind: input, shape index: {}]   ;;  %s930_s1 = inlined_call_operand.hbm [shape: f32[16,36], index: 1, kind: input, shape index: {}]   ;;  %s931_s2 = inlined_call_operand.hbm [shape: f32[16,512], index: 2, kind: output, shape index: {0}]   ;;  %s932_s3 = inlined_call_operand.vmem [shape: f32[16,1], index: 3, kind: output, shape index: {1}]   ;;  %s933_s4 = inlined_call_operand.vmem [shape: f32[16,1], index: 4, kind: output, shape index: {2}]  }
   0x1   :  { %12 = vsyncpa [#allocation3 + $0x1], 0 }
   0x2   :  { %13 = vsyncpa [#allocation6], 0 }
   0x3   :  { %14 = vsyncpa [#allocation4], 0 }
   0x4   :  { %16 = vsyncpa [#allocation4 + $0x1], 0  ;;  %s725_s15 = smov 0   ;;  %s727_s16 = smov 0  }
   0x5   :  { %s729_s17 = smov 0   ;;  %s731_s18 = smov 0  }
   0x6 LB: > { %s746_s19 = sadd.s32 4294967295, %s688_s18   ;;  %s457_s20 = sadd.s32 4294967294, %s688_s18   ;;  %s688_s18 = sphi %s731_s18, %s944_s18   ;;  %s684_s17 = sphi %s729_s17, %s943_s17   ;;  %s680_s16 = sphi %s727_s16, %s942_s16   ;;  %s676_s15 = sphi %s725_s15, %s941_s15  }
   0x7   : > { %p42_p0 = scmp.ne.s32.totalorder %s680_s16, %s676_s15  ;;  %p43_p1 = scmp.eq.s32.totalorder %s746_s19, 0 }
   0x8   : > { %p87_p2 = scmp.eq.s32.totalorder %s746_s19, 1  ;;  %p93_p3 = scmp.eq.s32.totalorder %s457_s20, 1 }
   0x9   : > { %p755_p4 = por %p43_p1, %p42_p0  ;;  %p458_p5 = scmp.ge.s32.totalorder %s688_s18, 1 }
   0xa   : > { %p760_p6 = por %p93_p3, %p42_p0  ;;  %p142_p7 = scmp.lt.s32.totalorder %s688_s18, 3 }
   0xb   : > { %s153_s25 = sshll.u32 %s930_s1, 4  ;;  %s690_s27 = smov [#allocation5]   ;;  %s154_s25 = int_to_ptr.hbm [resolvable:$true] %s153_s25 }
   0xc   : > { %p769_p9 = pnand %p458_p5, %p142_p7  ;;  %s155_s28 = sshll.u32 %s690_s27, 4  ;;  %s156_s28 = int_to_ptr.vmem [resolvable:$true] %s155_s28 }
   0xd   : > { %s779_s29 = sadd.s32 1, %s688_s18   ;;  %s691_s30 = smov 128  }
   0xe   : > { %p500_p10 = pneg %p769_p9  ;;  %s692_s5 = smov 8  }
   0xf   : > { %s26_s6 = ssub.s32 %s688_s18, %s779_s29  ;;  %s29_s7 = sadd.s32 1, %s684_s17 }
  0x10   : > { %p501_p11 = pnand %p500_p10, %p43_p1  ;;  %p27_p13 = scmp.eq.s32.totalorder %s26_s6, 0 }
  0x11   : > { %p36_p0 = scmp.ne.s32.totalorder %s684_s17, %s680_s16  ;;  %p37_p3 = scmp.eq.s32.totalorder %s688_s18, 0 }
  0x12   : > { %503 = dma.hbm_to_vmem [thread:$0]  (!%p501_p11), %s154_s25, 256, %s156_s28, [#allocation6], %s691_s30, %s691_s30, %s692_s5  }
  0x13   : > { %p513_p5 = scmp.lt.s32.totalorder %s688_s18, 2  ;;  %p38_p7 = por %p37_p3, %p36_p0 }
  0x14   : > { %s789_s8 = scalar_select %p27_p13, %s684_s17, %s29_s7  }
  0x15   : > { %p793_p8 = por %p87_p2, %p36_p0  ;;  %s169_s10 = sand.u32 1, %s684_s17  }
  0x16   : > { %s478_s11 = sshll.u32 %s688_s18, 4  ;;  %s490_s12 = smul.u32 80, %s169_s10 }
  0x17   : > { %s178_s20 = scalar_lea.hbm %s929_s0, %s478_s11  ;;  %p802_p10 = pnand %p513_p5, %p38_p7 }
  0x18   : > { %s179_s24 = sshll.u32 %s178_s20, 4  ;;  %s173_s25 = scalar_lea.vmem [#allocation2], %s490_s12  ;;  %s180_s24 = int_to_ptr.hbm [resolvable:$true] %s179_s24 }
  0x19   : > { %s181_s27 = sshll.u32 %s173_s25, 4  ;;  %s170_s28 = scalar_lea.sflag [#allocation3], %s169_s10  ;;  %s182_s27 = int_to_ptr.vmem [resolvable:$true] %s181_s27 }
  0x1a   : > { %s588_s30 = sshra.s32 %s180_s24, 4  ;;  %p592_p11 = pneg %p802_p10  ;;  %s589_s30 = int_to_ptr.hbm [resolvable:$true] %s588_s30 }
  0x1b   : > { %s590_s5 = scalar_lea.hbm %s589_s30, 80  ;;  %s595_s11 = scalar_lea.hbm %s929_s0, 160 }
  0x1c   : > { %p591_p2 = scmp.ne.s32.totalorder %s589_s30, %s590_s5  ;;  %p596_p3 = scmp.lt.s32.totalorder %s589_s30, %s929_s0 }
  0x1d   : > { %p597_p5 = scmp.lt.s32.totalorder %s595_s11, %s590_s5 }
  0x1e   : > { %p593_p13 = pnand %p592_p11, %p591_p2 }
  0x1f   : > { %p598_p7 = por %p597_p5, %p596_p3 }
  0x20   : > { %p594_p0 = pneg %p593_p13 }
  0x22   : > { %p599_p12 = pnand %p598_p7, %p594_p0 }
  0x24   : > { %602 = shalt.err (!%p599_p12)
}
  0x25   : > { %s693_s10 = smov 512   ;;  %s694_s12 = smov 256  }
  0x26   : > { %s695_s20 = smov 16   ;;  %193 = sbr.rel (%p769_p9) target bundleno = 326 (0x146), region = 28 }
  0x27   : > { %507 = dma.hbm_to_vmem [thread:$0]  (!%p802_p10), %s180_s24, 1280, %s182_s27, %s170_s28, %s693_s10, %s694_s12, %s695_s20  }
  0x28   : > { %s819_s25 = sand.u32 (!%p769_p9), 1, %s680_s16  }
  0x29   : > { %s491_s30 = smul.u32 (!%p769_p9), 80, %s819_s25  ;;  %s196_s5 = scalar_lea.sflag (!%p769_p9), [#allocation3], %s819_s25 }
  0x2b   : > { %s823_s6 = scalar_lea.vmem [#allocation2], %s491_s30 }
  0x2c   : > { %663 = dma.done.wait (%p755_p4), %s196_s5, 1280  }
  0x2d   : > { %665 = vsyncadd (%p755_p4), %s196_s5, 4294966016 }
  0x2e   : > { %667 = dma.done.wait (%p43_p1), [#allocation6], 256  }
  0x2f   : > { %669 = vsyncadd (%p43_p1), [#allocation6], 4294967040  ;;  %s465_s26 = sshll.u32 %s819_s25, 5  ;;  %p939_p9 = scmp.ne.s32.totalorder %s746_s19, 0 }
  0x30   : > { %s834_s23 = scalar_lea.vmem [#allocation7], %s465_s26 }
  0x31   : > { %235 = sbr.rel (%p939_p9) target bundleno = 59 (0x3b), region = 40 }
  0x36   : > { %vm236_vm0 = vcmask 7168   ;;  %v696_v0 = vmov 0.0  }
  0x37   : > { %237 = vst.msk [vmem:[%s932_s3] sm:$0xff] %vm236_vm0, %v696_v0 }
  0x38   : > { %238 = vst.msk [vmem:[%s932_s3 + $0x8] sm:$0xff] %vm236_vm0, %v696_v0 }
  0x39   : > { %239 = vst.msk [vmem:[%s933_s4] sm:$0xff] %vm236_vm0, %v696_v0 }
  0x3a   : > { %240 = vst.msk [vmem:[%s933_s4 + $0x8] sm:$0xff] %vm236_vm0, %v696_v0 }
  0x3b PF: > { %v251_v1 = vld [vmem:[%s823_s6 + $0x40] sm:$0xf]  ;;  %vm260_vm1 = vcmask 1043456   ;;  %v252_v2 = vld [vmem:[%s823_s6 + $0x48] sm:$0xf]  ;;  %v249_v3 = vld [vmem:[%s823_s6 + $0x30] sm:$0xff] }
  0x3c   : > { %467 = vmatpush.msk.msra.mxu0 %vm260_vm1, %v251_v1  ;;  %470 = vmatpush.msk.msra.mxu1 %vm260_vm1, %v252_v2  ;;  %v250_v4 = vld [vmem:[%s823_s6 + $0x38] sm:$0xff]  ;;  %v247_v5 = vld [vmem:[%s823_s6 + $0x20] sm:$0xff]  ;;  %v248_v6 = vld [vmem:[%s823_s6 + $0x28] sm:$0xff]  ;;  %vm253_vm2 = vcmask 293888   ;;  %s479_s10 = sshll.u32 %s746_s19, 4  ;;  %s359_s5 = sshll.u32 %s834_s23, 4  ;;  %s867_s5 = int_to_ptr.vmem [resolvable:$true] %s359_s5 }
  0x3d   : > { %480 = vmatpush.msk.msra.mxu2 %vm260_vm1, %v251_v1  ;;  %485 = vmatpush.msk.msra.mxu3 %vm260_vm1, %v252_v2  ;;  %v245_v7 = vld [vmem:[%s823_s6 + $0x10] sm:$0xff]  ;;  %v246_v8 = vld [vmem:[%s823_s6 + $0x18] sm:$0xff]  ;;  %v243_v9 = vld [vmem:[%s823_s6] sm:$0xff]  ;;  %s358_s30 = scalar_lea.hbm %s931_s2, %s479_s10  ;;  %s347_s19 = scalar_lea.sflag [#allocation4], %s819_s25 }
  0x3e   : > { %279 = vmatpush.msra.mxu0 %v249_v3  ;;  %302 = vmatpush.msra.mxu1 %v250_v4  ;;  %v244_v10 = vld [vmem:[%s823_s6 + $0x8] sm:$0xff]  ;;  %v241_v11 = vld [vmem:[#allocation5] sm:$0xff]  ;;  %s361_s6 = sshll.u32 %s358_s30, 4  ;;  %s638_s28 = scalar_lea.hbm %s931_s2, 64  ;;  %s869_s6 = int_to_ptr.hbm [resolvable:$true] %s361_s6 }
  0x3f   : > { %481 = vmatpush.msra.mxu2 %v249_v3  ;;  %486 = vmatpush.msra.mxu3 %v250_v4  ;;  %v242_v12 = vld [vmem:[#allocation5 + $0x8] sm:$0xff]  ;;  %s632_s26 = sshra.s32 %s869_s6, 4  ;;  %s633_s26 = int_to_ptr.hbm [resolvable:$true] %s632_s26 }
  0x40   : > { %280 = vmatpush.msra.mxu0 %v247_v5  ;;  %303 = vmatpush.msra.mxu1 %v248_v6  ;;  %s634_s24 = scalar_lea.hbm %s633_s26, 32  ;;  %p639_p10 = scmp.lt.s32.totalorder %s633_s26, %s931_s2 }
  0x41   : > { %482 = vmatpush.msra.mxu2 %v247_v5  ;;  %487 = vmatpush.msra.mxu3 %v248_v6  ;;  %p635_p1 = scmp.ne.s32.totalorder %s633_s26, %s634_s24  ;;  %p640_p2 = scmp.lt.s32.totalorder %s638_s28, %s634_s24 }
  0x42   : > { %281 = vmatpush.msra.mxu0 %v245_v7  ;;  %304 = vmatpush.msra.mxu1 %v246_v8 }
  0x43   : > { %483 = vmatpush.msra.mxu2 %v245_v7  ;;  %488 = vmatpush.msra.mxu3 %v246_v8  ;;  %p636_p4 = pnand %p635_p1, %p793_p8  ;;  %p641_p11 = por %p640_p2, %p639_p10 }
  0x44   : > { %282 = vmatpush.msra.mxu0 %v243_v9  ;;  %305 = vmatpush.msra.mxu1 %v244_v10 }
  0x45   : > { %468 = vmatmul.msk.f32.vlgmr.msra.gmra.mxu0 %vm253_vm2, %v241_v11  ;;  %471 = vmatmul.msk.f32.vlgmr.msra.gmra.mxu1 %vm253_vm2, %v241_v11  ;;  %p637_p12 = pneg %p636_p4 }
  0x46   : > { %484 = vmatpush.msra.mxu2 %v243_v9  ;;  %489 = vmatpush.msra.mxu3 %v244_v10 }
  0x47   : > { %469 = vmatmul.msk.f32.vlgmr.msra.gmra.mxu2 %vm253_vm2, %v242_v12  ;;  %472 = vmatmul.msk.f32.vlgmr.msra.gmra.mxu3 %vm253_vm2, %v242_v12  ;;  %p642_p13 = pnand %p641_p11, %p637_p12 }
  0xc2   : > { %v284_v13 = vpop.f32.mrf.mxu0  ;;  %v307_v14 = vpop.f32.mrf.mxu1 }
  0xc3   : > { %313 = vst [vmem:[%s834_s23] sm:$0xff] %v284_v13  ;;  %v332_v15 = vmul.f32 %v284_v13, %v284_v13  ;;  %v333_v16 = vmul.f32 %v307_v14, %v307_v14  ;;  %v319_v17 = vadd.f32 %v307_v14, %v284_v13 }
  0xc4   : > { %314 = vst [vmem:[%s834_s23 + $0x8] sm:$0xff] %v307_v14 }
  0xc5   : > { %320 = vadd.xlane.f32.xlu0 %v319_v17  ;;  %v336_v18 = vadd.f32 %v333_v16, %v332_v15 }
  0xc7   : > { %337 = vadd.xlane.f32.xlu1 %v336_v18 }
  0xca   : > { %v287_v19 = vpop.f32.mrf.mxu2  ;;  %v310_v20 = vpop.f32.mrf.mxu3 }
  0xcb   : > { %315 = vst [vmem:[%s834_s23 + $0x10] sm:$0xff] %v287_v19  ;;  %v334_v21 = vmul.f32 %v287_v19, %v287_v19  ;;  %v335_v22 = vmul.f32 %v310_v20, %v310_v20  ;;  %v322_v23 = vadd.f32 %v310_v20, %v287_v19 }
  0xcc   : > { %316 = vst [vmem:[%s834_s23 + $0x18] sm:$0xff] %v310_v20 }
  0xcd   : > { %323 = vadd.xlane.f32.xlu0 %v322_v23  ;;  %v339_v24 = vadd.f32 %v335_v22, %v334_v21 }
  0xce   : > { %645 = shalt.err (!%p642_p13)
}
  0xcf   : > { %s697_s25 = smov 256   ;;  %s698_s23 = smov 512   ;;  %340 = vadd.xlane.f32.xlu1 %v339_v24  ;;  %v317_v25 = vld [vmem:[%s932_s3] sm:$0xff]  ;;  %vm327_vm3 = vcmask 7168   ;;  %v318_v31 = vld [vmem:[%s932_s3 + $0x8] sm:$0xff] }
  0xd0   : > { %s699_s13 = smov 16   ;;  %v330_v27 = vld [vmem:[%s933_s4] sm:$0xff]  ;;  %v331_v33 = vld [vmem:[%s933_s4 + $0x8] sm:$0xff] }
  0xd1   : > { %498 = dma.vmem_to_hbm [thread:$0]  (%p793_p8), %s867_s5, 512, %s869_s6, %s347_s19, %s697_s25, %s698_s23, %s699_s13  }
 0x138   : > { %v321_v26 = vpop.xlane.xlu0 %320 }
 0x139   : > { %v325_v28 = vadd.f32 %v321_v26, %v317_v25 }
 0x13a   : > { %v338_v29 = vpop.xlane.xlu1 %337 }
 0x13b   : > { %328 = vst.msk [vmem:[%s932_s3] sm:$0xff] %vm327_vm3, %v325_v28  ;;  %v342_v30 = vadd.f32 %v338_v29, %v330_v27 }
 0x13d   : > { %344 = vst.msk [vmem:[%s933_s4] sm:$0xff] %vm327_vm3, %v342_v30 }
 0x140   : > { %v324_v32 = vpop.xlane.xlu0 %323 }
 0x141   : > { %v326_v34 = vadd.f32 %v324_v32, %v318_v31 }
 0x142   : > { %v341_v35 = vpop.xlane.xlu1 %340 }
 0x143   : > { %329 = vst.msk [vmem:[%s932_s3 + $0x8] sm:$0xff] %vm327_vm3, %v326_v34  ;;  %v343_v36 = vadd.f32 %v341_v35, %v331_v33 }
 0x145   : > { %345 = vst.msk [vmem:[%s933_s4 + $0x8] sm:$0xff] %vm327_vm3, %v343_v36 }
 0x146 PF: > { %s388_s25 = sand.u32 1, %s676_s15   ;;  %p940_p8 = scmp.ge.s32.totalorder %s688_s18, 2 }
 0x147   : > { %s389_s23 = scalar_lea.sflag [#allocation4], %s388_s25 }
 0x148   : > { %p509_p0 = pnand %p940_p8, %p760_p6 }
 0x14a   : > { %p510_p3 = pneg %p509_p0 }
 0x14c   : > { %671 = dma.done.wait (%p510_p3), %s389_s23, 512  }
 0x14d   : > { %673 = vsyncadd (%p510_p3), %s389_s23, 4294966784  ;;  %p19_p5 = scmp.ge.s32.totalorder %s779_s29, 4   ;;  %s941_s15 = smov %s680_s16 }
 0x14e   : > { %s942_s16 = smov %s684_s17  ;;  %s943_s17 = smov %s789_s8 }
 0x14f   : > { %s944_s18 = smov %s779_s29  ;;  %21 = sbr.rel (!%p19_p5) target bundleno = 6 (0x6), region = 97 }
 0x154   :  { %395 = vsyncpa [#allocation3], 1 }
 0x155   :  { %397 = vsyncpa [#allocation3 + $0x1], 1 }
 0x156   :  { %398 = vsyncpa [#allocation6], 1 }
 0x157   :  { %399 = vsyncpa [#allocation4], 1 }
 0x158   :  { %401 = vsyncpa [#allocation4 + $0x1], 1 }

</bundles_post_ra>
